<compile_context>
chip_gen: v6e
topology: v6e:2x2x1
jax: 0.10.0
libtpu: 0.0.40
codegen_flags: <defaults>
</compile_context>

<pallas_src>
import functools
import numpy as np
import jax
import jax.numpy as jnp
from jax.experimental import pallas as pl
from jax.experimental.pallas import tpu as pltpu


def _round_up(a, m):
    return -(-a // m) * m


# ----------------------------------------------------------------------------
# Kernel bodies
# ----------------------------------------------------------------------------
def _bl_kernel_single(x_ref, w_ref, b_ref, o_ref):
    # kt == 1: one MXU matmul per (g, n) tile; bias folded into the store.
    # x_ref: (TN, Kg)   w_ref: (1, Kg, Mg)   b_ref: (1, Mg)   o_ref: (TN, Mg)
    acc = jnp.dot(x_ref[...], w_ref[0], preferred_element_type=jnp.float32)
    o_ref[...] = (acc + b_ref[...].astype(jnp.float32)).astype(o_ref.dtype)


def _bl_kernel_resident(x_ref, w_ref, b_ref, o_ref, acc_ref, *, tk):
    # kt > 1, full per-block weight resident in VMEM (DMA'd once per block).
    # x_ref: (TN, tk)   w_ref: (1, Kg, Mg)   acc_ref: (TN, Mg) f32 scratch
    r = pl.program_id(2)

    @pl.when(r == 0)
    def _init():
        acc_ref[...] = jnp.zeros_like(acc_ref) + b_ref[...].astype(jnp.float32)

    off = pl.multiple_of(r * tk, 128)   # tk is always a multiple of 128 here
    acc_ref[...] += jnp.dot(x_ref[...], w_ref[0, pl.ds(off, tk), :],
                            preferred_element_type=jnp.float32)

    @pl.when(r == pl.num_programs(2) - 1)
    def _store():
        o_ref[...] = acc_ref[...].astype(o_ref.dtype)


def _bl_kernel_chunked(x_ref, w_ref, b_ref, o_ref, acc_ref):
    # kt > 1 and per-block weight too big for VMEM: stream weight K-chunks.
    # x_ref: (TN, TK)   w_ref: (1, TK, Mg)   acc_ref: (TN, Mg) f32 scratch
    r = pl.program_id(2)

    @pl.when(r == 0)
    def _init():
        acc_ref[...] = jnp.zeros_like(acc_ref) + b_ref[...].astype(jnp.float32)

    acc_ref[...] += jnp.dot(x_ref[...], w_ref[0],
                            preferred_element_type=jnp.float32)

    @pl.when(r == pl.num_programs(2) - 1)
    def _store():
        o_ref[...] = acc_ref[...].astype(o_ref.dtype)


# ----------------------------------------------------------------------------
# Wrapper
# ----------------------------------------------------------------------------
def fold_block_diag_params(weight, bias, k):
    """Fold small, non-128-aligned per-block weights into ONE block-diagonal
    dense (D, Mg) weight with a lane-dense (multiple-of-128) output width.

    Call once at parameter-init time and pass the result to block_linear() via
    `folded=` so the dense weight is not re-materialized in HBM every forward.
    Only sensible while k*dout is small (the dense weight is k-fold redundant).
    """
    kk, din, dout = weight.shape
    assert kk == k
    D, nout = k * din, k * dout
    eye = jnp.eye(k, dtype=weight.dtype)
    w_dense = jnp.einsum("kde,kj->kdje", weight, eye).reshape(D, nout)
    Mg = max(_round_up(nout, 128), 128)
    if Mg != nout:
        w_dense = jnp.pad(w_dense, ((0, 0), (0, Mg - nout)))
        bias_p = jnp.pad(bias, ((0, 0), (0, Mg - nout)))
    else:
        bias_p = bias
    return w_dense[None], bias_p, Mg


def block_linear(x, weight, bias, k, *, tn=None, compute_dtype=None,
                 folded=None, max_resident_weight_bytes=8 * 1024 * 1024):
    """BlockLinear forward.
    x: (..., ninp); weight: (k, ninp//k, nout//k); bias: (1, nout).
    Returns (..., nout) in x.dtype."""
    *other, D = x.shape
    kk, din, dout = weight.shape
    assert kk == k and D == k * din
    nout = k * dout
    assert bias.shape == (1, nout)
    N = int(np.prod(other)) if other else 1

    cdt = jnp.dtype(compute_dtype) if compute_dtype is not None else jnp.dtype(x.dtype)
    out_dtype = x.dtype

    x_in = jnp.reshape(x, (N, D))          # bands selected by index_map, no transpose
    if x_in.dtype != cdt:
        x_in = x_in.astype(cdt)

    aligned = (din % 128 == 0) and (dout % 128 == 0)
    if aligned:
        G, Kg, Mg = k, din, dout
        wg, bias_g = weight, bias          # wg: (k, din, dout)
    else:
        # Tiny / non-128-aligned blocks: one block-diagonal dense matmul with
        # a lane-dense output.  Prefer passing a precomputed `folded=`.
        if folded is None:
            # TODO(synk): for large unaligned shapes, pad dout per block to 128
            # instead of folding (the fold is k-fold redundant in weight bytes).
            folded = fold_block_diag_params(weight, bias, k)
        wg, bias_g, Mg = folded
        G, Kg = 1, D
    if wg.dtype != cdt:
        wg = wg.astype(cdt)

    in_isz = cdt.itemsize
    out_isz = jnp.dtype(out_dtype).itemsize
    b_isz = jnp.dtype(bias_g.dtype).itemsize
    sublane = {4: 8, 2: 16, 1: 32}.get(in_isz, 8)

    # ---- K (contraction) tiling inside each block ---------------------------
    TK = next((t for t in (512, 256, 128) if Kg % t == 0), Kg)
    kt = Kg // TK
    # keep the whole per-block weight resident across N-tiles when it fits
    resident_w = (kt == 1) or (2 * Kg * Mg * in_isz <= max_resident_weight_bytes)
    w_rows = Kg if resident_w else TK

    # ---- N (row) tiling ------------------------------------------------------
    def _footprint(tn_):
        f = 2 * (tn_ * TK * in_isz + w_rows * Mg * in_isz
                 + tn_ * Mg * out_isz + Mg * b_isz)
        if kt > 1:
            f += tn_ * Mg * 4
        return f

    if tn is None:
        if N < sublane:
            TN = N                                   # block dim == full row extent
        else:
            TN = min(_round_up(N, sublane), 512)
            while _footprint(TN) > (36 << 20) and TN > sublane:
                TN = max(_round_up(TN // 2, sublane), sublane)
    else:
        TN = max(_round_up(tn, sublane), sublane)

    nt = pl.cdiv(N, TN)
    # v7x megacore: make sure both TensorCores get a parallel tile.
    if tn is None and G * nt == 1 and N > sublane:
        TN = _round_up(pl.cdiv(N, 2), sublane)
        nt = pl.cdiv(N, TN)

    vmem_limit = int(min(max(_footprint(TN) + (4 << 20), 32 << 20), 48 << 20))

    flops = 2 * N * G * Kg * Mg
    w_hbm_reads = 1 if resident_w else nt
    bytes_accessed = int(N * D * in_isz
                         + w_hbm_reads * G * Kg * Mg * in_isz
                         + G * Mg * b_isz
                         + N * G * Mg * out_isz)

    out_shape = jax.ShapeDtypeStruct((N, G * Mg), out_dtype)

    if kt == 1:
        grid = (G, nt)
        in_specs = [
            pl.BlockSpec((TN, TK), lambda g, n: (n, g)),         # activation band
            pl.BlockSpec((1, Kg, Mg), lambda g, n: (g, 0, 0)),   # per-block weight
            pl.BlockSpec((1, Mg), lambda g, n: (0, g)),          # per-block bias
        ]
        out_specs = pl.BlockSpec((TN, Mg), lambda g, n: (n, g))
        scratch = ()
        kernel = _bl_kernel_single
        semantics = ("parallel", "parallel")
    else:
        grid = (G, nt, kt)
        if resident_w:
            w_spec = pl.BlockSpec((1, Kg, Mg), lambda g, n, r: (g, 0, 0))
            kernel = functools.partial(_bl_kernel_resident, tk=TK)
        else:
            w_spec = pl.BlockSpec((1, TK, Mg), lambda g, n, r: (g, r, 0))
            kernel = _bl_kernel_chunked
        in_specs = [
            pl.BlockSpec((TN, TK), lambda g, n, r: (n, g * kt + r)),
            w_spec,
            pl.BlockSpec((1, Mg), lambda g, n, r: (0, g)),
        ]
        out_specs = pl.BlockSpec((TN, Mg), lambda g, n, r: (n, g))
        scratch = (pltpu.VMEM((TN, Mg), jnp.float32),)
        semantics = ("parallel", "parallel", "arbitrary")

    out2 = pl.pallas_call(
        kernel,
        out_shape=out_shape,
        grid_spec=pltpu.PrefetchScalarGridSpec(
            num_scalar_prefetch=0,
            grid=grid,
            in_specs=in_specs,
            out_specs=out_specs,
            scratch_shapes=scratch,
        ),
        compiler_params=pltpu.CompilerParams(
            dimension_semantics=semantics,
            vmem_limit_bytes=vmem_limit,
        ),
        cost_estimate=pl.CostEstimate(
            flops=flops, transcendentals=0, bytes_accessed=bytes_accessed),
    )(x_in, wg, bias_g)

    if G * Mg != nout:                    # only the tiny folded path pads columns
        out2 = out2[:, :nout]
    return out2.reshape(*other, nout)


# ----------------------------------------------------------------------------
# Init + reference
# ----------------------------------------------------------------------------
def init_block_linear_params(key, ninp, nout, k, dtype=jnp.float32):
    """xavier_uniform_-style init for weight, zeros for bias (as in PyTorch)."""
    din, dout = ninp // k, nout // k
    fan_in, fan_out = din * dout, k * dout
    limit = float(np.sqrt(6.0 / (fan_in + fan_out)))
    weight = jax.random.uniform(key, (k, din, dout), dtype=dtype,
                                minval=-limit, maxval=limit)
    bias = jnp.zeros((1, nout), dtype=dtype)
    return weight, bias


def _reference(x, weight, bias, k):
    *other, D = x.shape
    _, din, dout = weight.shape
    N = int(np.prod(other)) if other else 1
    xr = jnp.transpose(x.reshape(N, k, din), (1, 0, 2))
    y = jnp.einsum("knd,kde->kne", xr, weight)
    y = jnp.transpose(y, (1, 0, 2)).reshape(*other, k * dout) + bias
    return y


if __name__ == "__main__":
    key = jax.random.PRNGKey(0)
    keys = jax.random.split(key, 6)
    B, S = 2, 8

    # Test 1: tiny non-128-aligned blocks (din = dout = 8) -> folded dense path,
    # fold precomputed once at "init" time (avoids a per-forward HBM pass).
    ninp1, nout1, k1 = 32, 32, 4
    w1, b1 = init_block_linear_params(keys[0], ninp1, nout1, k1)
    x1 = jax.random.normal(keys[1], (B, S, ninp1), dtype=jnp.float32)
    folded1 = fold_block_diag_params(w1, b1, k1)
    out1 = jax.block_until_ready(block_linear(x1, w1, b1, k1, folded=folded1))
    assert out1.shape == (B, S, nout1)
    np.testing.assert_allclose(np.asarray(out1),
                               np.asarray(_reference(x1, w1, b1, k1)),
                               rtol=1e-2, atol=1e-2)

    # Test 2: 128-aligned blocks (din = dout = 128) -> kt == 1 single-shot path.
    ninp2, nout2, k2 = 256, 256, 2
    w2, b2 = init_block_linear_params(keys[2], ninp2, nout2, k2)
    x2 = jax.random.normal(keys[3], (B, S, ninp2), dtype=jnp.float32)
    out2 = jax.block_until_ready(block_linear(x2, w2, b2, k2))
    assert out2.shape == (B, S, nout2)
    np.testing.assert_allclose(np.asarray(out2),
                               np.asarray(_reference(x2, w2, b2, k2)),
                               rtol=2e-2, atol=2e-2)

    # Test 3: kt > 1 with the per-block weight resident in VMEM
    # (din = 1024 -> TK = 512, kt = 2).
    ninp3, nout3, k3 = 2048, 256, 2
    w3, b3 = init_block_linear_params(keys[4], ninp3, nout3, k3)
    x3 = jax.random.normal(keys[5], (B, S, ninp3), dtype=jnp.float32)
    ref3 = _reference(x3, w3, b3, k3)
    out3 = jax.block_until_ready(block_linear(x3, w3, b3, k3))
    np.testing.assert_allclose(np.asarray(out3), np.asarray(ref3),
                               rtol=2e-2, atol=2e-2)

    # Test 4: same shape, force the streamed K-chunk (chunked-weight) fallback.
    out4 = jax.block_until_ready(
        block_linear(x3, w3, b3, k3, max_resident_weight_bytes=0))
    np.testing.assert_allclose(np.asarray(out4), np.asarray(ref3),
                               rtol=2e-2, atol=2e-2)

    # Test 5: opt-in bf16 compute (f32 accumulation, f32 output).
    out5 = jax.block_until_ready(
        block_linear(x2, w2, b2, k2, compute_dtype=jnp.bfloat16))
    np.testing.assert_allclose(np.asarray(out5),
                               np.asarray(_reference(x2, w2, b2, k2)),
                               rtol=3e-2, atol=3e-2)

    print("KERNEL_OK")
</pallas_src>

<mosaic_0001>
module attributes {stable_mosaic.version = 11 : i64} {
  func.func @_bl_kernel_single(%arg0: i32, %arg1: i32, %arg2: memref<8x32xf32, #tpu.memory_space<vmem>>, %arg3: memref<1x32x128xf32, #tpu.memory_space<vmem>>, %arg4: memref<1x128xf32, #tpu.memory_space<vmem>>, %arg5: memref<8x128xf32, #tpu.memory_space<vmem>>) attributes {dimension_semantics = [#tpu.dimension_semantics<parallel>, #tpu.dimension_semantics<parallel>], iteration_bounds = array<i64: 1, 2>, scalar_prefetch = 0 : i64, scratch_operands = 0 : i64, tpu.core_type = #tpu.core_type<tc>, window_params = [{transform_indices = @transform_0, window_bounds = array<i64: 8, 32>}, {transform_indices = @transform_1, window_bounds = array<i64: 1, 32, 128>}, {transform_indices = @transform_2, window_bounds = array<i64: 1, 128>}, {transform_indices = @transform_3, window_bounds = array<i64: 8, 128>}]} {
    %c0 = arith.constant 0 : index
    %c0_0 = arith.constant 0 : index
    %0 = vector.load %arg2[%c0, %c0_0] : memref<8x32xf32, #tpu.memory_space<vmem>>, vector<8x32xf32>
    %c0_1 = arith.constant 0 : index
    %c0_2 = arith.constant 0 : index
    %c0_3 = arith.constant 0 : index
    %1 = vector.load %arg3[%c0_1, %c0_2, %c0_3] : memref<1x32x128xf32, #tpu.memory_space<vmem>>, vector<1x32x128xf32>
    %2 = vector.shape_cast %1 : vector<1x32x128xf32> to vector<32x128xf32>
    %cst = arith.constant dense<0.000000e+00> : vector<8x128xf32>
    %3 = tpu.matmul %0, %2, %cst {dimension_numbers = #tpu.dot_dimension_numbers<[1], [0], [0], [1], [0, 0, 1, 1], [], []>} : vector<8x32xf32>, vector<32x128xf32>, vector<8x128xf32> -> vector<8x128xf32>
    %c0_4 = arith.constant 0 : index
    %c0_5 = arith.constant 0 : index
    %4 = vector.load %arg4[%c0_4, %c0_5] : memref<1x128xf32, #tpu.memory_space<vmem>>, vector<1x128xf32>
    %5 = vector.broadcast %4 : vector<1x128xf32> to vector<8x128xf32>
    %6 = arith.addf %3, %5 : vector<8x128xf32>
    %c0_6 = arith.constant 0 : index
    %c0_7 = arith.constant 0 : index
    %7 = vector.load %arg5[%c0_6, %c0_7] : memref<8x128xf32, #tpu.memory_space<vmem>>, vector<8x128xf32>
    tpu.vector_store %arg5[%c0_6, %c0_7], %6 {strides = array<i32>} : memref<8x128xf32, #tpu.memory_space<vmem>>, vector<8x128xf32>,
    return
  }
  func.func @transform_0(%arg0: i32, %arg1: i32) -> (i32, i32) {
    %c0_i32 = arith.constant 0 : i32
    return %arg1, %arg0 : i32, i32
  }
  func.func @transform_1(%arg0: i32, %arg1: i32) -> (i32, i32, i32) {
    %c0_i32 = arith.constant 0 : i32
    %c0_i32_0 = arith.constant 0 : i32
    %c0_i32_1 = arith.constant 0 : i32
    return %arg0, %c0_i32, %c0_i32_0 : i32, i32, i32
  }
  func.func @transform_2(%arg0: i32, %arg1: i32) -> (i32, i32) {
    %c0_i32 = arith.constant 0 : i32
    %c0_i32_0 = arith.constant 0 : i32
    return %c0_i32, %arg0 : i32, i32
  }
  func.func @transform_3(%arg0: i32, %arg1: i32) -> (i32, i32) {
    %c0_i32 = arith.constant 0 : i32
    return %arg1, %arg0 : i32, i32
  }
}

</mosaic_0001>

<bundles_post_ra>
// kernel: tpu_custom_call.1
= control target key start
LH: loop header
LB: loop body
LE: loop exit
PB: predicated region body
PF: predicated region fallthrough
CT: control target
= control target key end

     0   :  { %8 = vsyncpa [#allocation3], 0  ;;  %s900_s0 = inlined_call_operand.hbm [shape: f32[16,32], index: 0, kind: input, shape index: {}]   ;;  %s901_s1 = inlined_call_operand.hbm [shape: f32[1,32,128], index: 1, kind: input, shape index: {}]   ;;  %s902_s2 = inlined_call_operand.vmem [shape: f32[1,128], index: 2, kind: input, shape index: {}]   ;;  %s903_s3 = inlined_call_operand.hbm [shape: f32[16,128], index: 3, kind: output, shape index: {}]  }
   0x1   :  { %10 = vsyncpa [#allocation3 + $0x1], 0 }
   0x2   :  { %11 = vsyncpa [#allocation6], 0 }
   0x3   :  { %12 = vsyncpa [#allocation4], 0 }
   0x4   :  { %14 = vsyncpa [#allocation4 + $0x1], 0  ;;  %s724_s12 = smov 0   ;;  %s726_s13 = smov 0  }
   0x5   :  { %s728_s14 = smov 0   ;;  %s730_s15 = smov 0  }
   0x6   :  { %s732_s16 = smov 0   ;;  %s734_s17 = smov 0  }
   0x7 LB: > { %s446_s18 = sadd.s32 4294967295, %s695_s17   ;;  %s447_s19 = sadd.s32 4294967294, %s695_s17   ;;  %s695_s17 = sphi %s734_s17, %s20_s17   ;;  %s691_s16 = sphi %s732_s16, %s921_s16   ;;  %s687_s15 = sphi %s730_s15, %s920_s15   ;;  %s683_s14 = sphi %s728_s14, %s919_s14   ;;  %s679_s13 = sphi %s726_s13, %s918_s13   ;;  %s675_s12 = sphi %s724_s12, %s917_s12  }
   0x8   : > { %p54_p0 = scmp.ne.s32.totalorder %s679_s13, %s675_s12  ;;  %p758_p1 = scmp.eq.s32.totalorder %s446_s18, 0 }
   0x9   : > { %p762_p2 = scmp.eq.s32.totalorder %s446_s18, 1  ;;  %p138_p3 = scmp.eq.s32.totalorder %s447_s19, 1 }
   0xa   : > { %p768_p4 = por %p758_p1, %p54_p0  ;;  %p448_p5 = scmp.ge.s32.totalorder %s695_s17, 1 }
   0xb   : > { %p773_p6 = por %p138_p3, %p54_p0  ;;  %p145_p7 = scmp.lt.s32.totalorder %s695_s17, 3 }
   0xc   : > { %s907_s22 = scalar_select %p768_p4, 1, 0 }
   0xd   : > { %s908_s23 = scalar_select %p773_p6, 1, 0 }
   0xe   : > { %p778_p8 = pnand %p448_p5, %p145_p7  ;;  %s697_s25 = smov [#allocation5]  }
   0xf   : > { %s160_s26 = sshll.u32 %s697_s25, 4  ;;  %s29_s28 = sadd.s32 1, %s691_s16  ;;  %s161_s26 = int_to_ptr.vmem [resolvable:$true] %s160_s26 }
  0x10   : > { %p488_p9 = pneg %p778_p8  ;;  %s568_s29 = scalar_lea.vmem %s161_s26, 512 }
  0x11   : > { %p569_p13 = scmp.ne.s32.totalorder %s161_s26, %s568_s29  ;;  %p576_p5 = scmp.lt.s32.totalorder %s161_s26, %s161_s26 }
  0x12   : > { %p787_p11 = pnand %p488_p9, %p758_p1  ;;  %p577_p7 = scmp.lt.s32.totalorder %s568_s29, %s568_s29 }
  0x14   : > { %p559_p12 = pneg %p787_p11  ;;  %p578_p6 = por %p577_p7, %p576_p5 }
  0x16   : > { %p571_p0 = pnand %p569_p13, %p559_p12 }
  0x18   : > { %p572_p3 = pneg %p571_p0 }
  0x1a   : > { %p579_p4 = pnand %p578_p6, %p572_p3 }
  0x1c   : > { %582 = shalt.err (!%p579_p4)
}
  0x1d   : > { %s698_s30 = smov 128   ;;  %s699_s4 = smov 8  }
  0x1e   : > { %491 = dma.hbm_to_vmem [thread:$0]  (!%p787_p11), %s901_s1, 512, %s161_s26, [#allocation6], %s698_s30, %s698_s30, %s699_s4  }
  0x1f   : > { %p30_p6 = scmp.ge.s32.totalorder %s29_s28, 2  ;;  %s41_s7 = sadd.s32 1, %s683_s14 }
  0x20   : > { %p48_p4 = scmp.ne.s32.totalorder %s683_s14, %s679_s13  ;;  %p49_p9 = scmp.eq.s32.totalorder %s695_s17, 0 }
  0x21   : > { %s923_s28 = smov (%p30_p6, %s29_s28), 0  ;;  %p501_p0 = scmp.lt.s32.totalorder %s695_s17, 2 }
  0x22   : > { %p805_p12 = por %p49_p9, %p48_p4  ;;  %p811_p13 = por %p762_p2, %p48_p4 }
  0x23   : > { %s36_s10 = ssub.s32 %s691_s16, %s923_s28  ;;  %s180_s11 = sand.u32 1, %s683_s14  }
  0x24   : > { %p39_p11 = scmp.eq.s32.totalorder %s36_s10, 0  ;;  %s452_s18 = sshll.u32 %s180_s11, 3 }
  0x25   : > { %s453_s25 = sshll.u32 %s691_s16, 7  ;;  %s184_s30 = scalar_lea.vmem [#allocation2], %s452_s18 }
  0x26   : > { %s820_s19 = scalar_select %p39_p11, %s683_s14, %s41_s7  }
  0x27   : > { %s190_s29 = scalar_lea.hbm %s900_s0, %s453_s25  ;;  %s192_s4 = sshll.u32 %s184_s30, 4  ;;  %s193_s4 = int_to_ptr.vmem [resolvable:$true] %s192_s4 }
  0x28   : > { %p828_p2 = pnand %p501_p0, %p805_p12  ;;  %s181_s5 = scalar_lea.sflag [#allocation3], %s180_s11 }
  0x29   : > { %s596_s6 = scalar_lea.vmem %s193_s4, 128  ;;  %s700_s7 = smov [#allocation2]  }
  0x2a   : > { %p585_p3 = pneg %p828_p2  ;;  %p597_p5 = scmp.ne.s32.totalorder %s193_s4, %s596_s6 }
  0x2b   : > { %s601_s10 = sshll.u32 %s700_s7, 4  ;;  %s602_s10 = int_to_ptr.vmem [resolvable:$false] %s601_s10 }
  0x2c   : > { %p599_p7 = pnand %p597_p5, %p585_p3  ;;  %s603_s25 = scalar_lea.vmem %s602_s10, 256 }
  0x2d   : > { %p604_p4 = scmp.lt.s32.totalorder %s193_s4, %s602_s10  ;;  %p605_p9 = scmp.lt.s32.totalorder %s603_s25, %s596_s6 }
  0x2e   : > { %p600_p6 = pneg %p599_p7 }
  0x2f   : > { %p606_p11 = por %p605_p9, %p604_p4 }
  0x31   : > { %p607_p10 = pnand %p606_p11, %p600_p6 }
  0x33   : > { %610 = shalt.err (!%p607_p10)
}
  0x34   : > { %495 = dma.hbm_to_vmem [thread:$0]  (!%p828_p2), %s190_s29, 128, %s193_s4, %s181_s5  }
  0x35   : > { %201 = sbr.rel (%p778_p8) target bundleno = 278 (0x116), region = 32  ;;  %s839_s8 = sand.u32 (!%p778_p8), 1, %s679_s13  }
  0x36   : > { %s455_s11 = sshll.u32 (!%p778_p8), %s839_s8, 3  ;;  %s204_s18 = scalar_lea.sflag (!%p778_p8), [#allocation3], %s839_s8 }
  0x37   : > { %s207_s26 = scalar_lea.vmem (!%p778_p8), [#allocation2], %s455_s11  ;;  %p914_p12 = scmp.ne.s32.totalorder (!%p778_p8), %s907_s22, 0 }
  0x3a   : > { %662 = dma.done.wait (%p914_p12), %s204_s18, 128  }
  0x3b   : > { %664 = vsyncadd (%p914_p12), %s204_s18, 4294967168 }
  0x3c   : > { %666 = dma.done.wait (%p758_p1), [#allocation6], 512  }
  0x3d   : > { %668 = vsyncadd (%p758_p1), [#allocation6], 4294966784  ;;  %v701_v0 = vmov 0.0   ;;  %vm702_vm0 = vmmov 0   ;;  %v244_v1 = vld [vmem:[#allocation5 + $0x18] sm:$0xff]  ;;  %v243_v2 = vld [vmem:[#allocation5 + $0x10] sm:$0xff] }
  0x3e   : > { %469 = vmatprep.subr.mxu0 %v701_v0  ;;  %477 = vmatprep.mubr.msk.f32.mxu0 %vm702_vm0, %v701_v0  ;;  %v242_v3 = vld [vmem:[#allocation5 + $0x8] sm:$0xff]  ;;  %v241_v4 = vld [vmem:[#allocation5] sm:$0xff]  ;;  %v240_v5 = vld [vmem:[%s207_s26] sm:$0xff]  ;;  %vm252_vm1 = vcmask 261120   ;;  %s461_s24 = sshll.u32 %s687_s15, 7  ;;  %s236_s27 = scalar_lea.vmem [#allocation7], %s455_s11 }
  0x3f   : > { %470 = vmatpush3.msra.mxu0 %v244_v1  ;;  %v458_v6 = vld [vmem:[%s902_s2] ss:$0 sm:$0xff]  ;;  %s342_s29 = sshll.u32 %s236_s27, 4  ;;  %s858_s21 = scalar_lea.hbm %s903_s3, %s461_s24  ;;  %s343_s29 = int_to_ptr.vmem [resolvable:$true] %s342_s29 }
  0x40   : > { %471 = vmatprep.subr.mxu0 %v701_v0  ;;  %s328_s5 = scalar_lea.sflag [#allocation4], %s839_s8  ;;  %s611_s6 = scalar_lea.vmem %s343_s29, 128 }
  0x41   : > { %472 = vmatpush3.msra.mxu0 %v243_v2  ;;  %p612_p1 = scmp.ne.s32.totalorder %s343_s29, %s611_s6  ;;  %s703_s7 = smov [#allocation7]  }
  0x42   : > { %473 = vmatprep.subr.mxu0 %v701_v0  ;;  %s615_s15 = sshll.u32 %s703_s7, 4  ;;  %s616_s15 = int_to_ptr.vmem [resolvable:$false] %s615_s15 }
  0x43   : > { %474 = vmatpush3.msra.mxu0 %v242_v3  ;;  %p613_p8 = pnand %p612_p1, %p811_p13  ;;  %s617_s10 = scalar_lea.vmem %s616_s15, 256 }
  0x44   : > { %475 = vmatprep.subr.mxu0 %v701_v0  ;;  %p618_p0 = scmp.lt.s32.totalorder %s343_s29, %s616_s15  ;;  %p619_p2 = scmp.lt.s32.totalorder %s617_s10, %s611_s6 }
  0x45   : > { %476 = vmatpush3.msra.mxu0 %v241_v4  ;;  %p614_p10 = pneg %p613_p8 }
  0x46   : > { %478 = vmatmul.mubr.msk.f32.vlgmr.msra.gmra.mxu0 %vm252_vm1, %v240_v5  ;;  %p620_p3 = por %p619_p2, %p618_p0 }
  0x48   : > { %p621_p5 = pnand %p620_p3, %p614_p10 }
 0x106   : > { %v322_v7 = vpop.f32.mrf.mxu0 }
 0x107   : > { %v323_v8 = vadd.f32 %v458_v6, %v322_v7 }
 0x108   : > { %v479_v9 = vpop.f32.mrf.mxu0 }
 0x109   : > { %326 = vst [vmem:[%s236_s27] sm:$0xff] %v323_v8 }
 0x10a   : > { %624 = shalt.err (!%p621_p5)
}
 0x10b   : > { %s625_s25 = scalar_lea.hbm %s858_s21, 128  ;;  %s629_s18 = scalar_lea.hbm %s903_s3, 256 }
 0x10c   : > { %p626_p7 = scmp.ne.s32.totalorder %s858_s21, %s625_s25  ;;  %p630_p9 = scmp.lt.s32.totalorder %s858_s21, %s903_s3 }
 0x10d   : > { %p631_p11 = scmp.lt.s32.totalorder %s629_s18, %s625_s25 }
 0x10e   : > { %p627_p6 = pnand %p626_p7, %p811_p13 }
 0x10f   : > { %p632_p12 = por %p631_p11, %p630_p9 }
 0x110   : > { %p628_p4 = pneg %p627_p6 }
 0x112   : > { %p633_p1 = pnand %p632_p12, %p628_p4 }
 0x114   : > { %636 = shalt.err (!%p633_p1)
}
 0x115   : > { %486 = dma.vmem_to_hbm [thread:$0]  (%p811_p13), %s343_s29, 128, %s858_s21, %s328_s5  }
 0x116 PF: > { %s354_s22 = sand.u32 1, %s675_s12   ;;  %p915_p8 = scmp.ne.s32.totalorder %s908_s23, 0 }
 0x117   : > { %p916_p10 = scmp.ge.s32.totalorder %s695_s17, 2  ;;  %s355_s24 = scalar_lea.sflag [#allocation4], %s354_s22 }
 0x119   : > { %p497_p0 = pnand %p916_p10, %p915_p8 }
 0x11b   : > { %p498_p2 = pneg %p497_p0 }
 0x11d   : > { %670 = dma.done.wait (%p498_p2), %s355_s24, 128  }
 0x11e   : > { %672 = vsyncadd (%p498_p2), %s355_s24, 4294967168  ;;  %s20_s17 = sadd.s32 1, %s695_s17   ;;  %s917_s12 = smov %s679_s13 }
 0x11f   : > { %p17_p3 = scmp.ge.s32.totalorder %s20_s17, 4   ;;  %s918_s13 = smov %s683_s14 }
 0x120   : > { %s919_s14 = smov %s820_s19  ;;  %s920_s15 = smov %s691_s16 }
 0x121   : > { %s921_s16 = smov %s923_s28  ;;  %19 = sbr.rel (!%p17_p3) target bundleno = 7 (0x7), region = 85 }
 0x126   :  { %360 = vsyncpa [#allocation3], 1 }
 0x127   :  { %362 = vsyncpa [#allocation3 + $0x1], 1 }
 0x128   :  { %363 = vsyncpa [#allocation6], 1 }
 0x129   :  { %364 = vsyncpa [#allocation4], 1 }
 0x12a   :  { %366 = vsyncpa [#allocation4 + $0x1], 1 }

</bundles_post_ra>
